<compile_context>
chip_gen: v6e
topology: v6e:2x2x1
jax: 0.10.0
libtpu: 0.0.40
codegen_flags: <defaults>
</compile_context>

<pallas_src>
import functools

import jax
import jax.numpy as jnp
from jax.experimental import pallas as pl
from jax.experimental.pallas import tpu as pltpu

LANE = 128
SUBLANE = 8


def _ceil_to(n, m):
    return ((n + m - 1) // m) * m


def _pad2(a, rows, cols):
    r, c = a.shape
    if rows == r and cols == c:
        return a
    return jnp.pad(a, ((0, rows - r), (0, cols - c)))


# ------------------------------------------------------------------
# Pallas kernel: entire PolicyNetwork forward (3 matmuls, fused heads)
# ------------------------------------------------------------------
def policy_kernel(x_ref, w1_ref, b1_ref, w2_ref, b2_ref, wh_ref, bh_ref,
                  out_ref, xpad_ref, *, action_dim, d_in):
    dp = w1_ref.shape[0]

    if d_in == dp:
        x = x_ref[...]
    else:
        # Zero-extend x from its natural d_in lanes to dp (=128) lanes in VMEM.
        # Memset every step (cheap: ~block_b/8 vreg stores) so padding lanes are
        # correct regardless of which TensorCore executes this grid step.
        xpad_ref[...] = jnp.zeros_like(xpad_ref)
        xpad_ref[:, :d_in] = x_ref[...]
        x = xpad_ref[...]

    # Two hidden layers.  Note: at large batch the binding VLIW slot here is the
    # EUP (tanh/exp), not the MXU -- the 128-lane vreg granularity of the padded
    # hidden dim is unavoidable.
    h1 = jnp.tanh(
        jnp.dot(x, w1_ref[...], preferred_element_type=jnp.float32) + b1_ref[...]
    )
    h2 = jnp.tanh(
        jnp.dot(h1, w2_ref[...], preferred_element_type=jnp.float32) + b2_ref[...]
    )

    # Fused heads: lanes [0:A] = mu logits, lanes [A:2A] = log-std logits.
    head = (
        jnp.dot(h2, wh_ref[...], preferred_element_type=jnp.float32) + bh_ref[...]
    )
    lane = jax.lax.broadcasted_iota(jnp.int32, head.shape, dimension=1)
    is_sigma = (lane >= action_dim) & (lane < 2 * action_dim)
    # exp only sees the sigma lanes (0 elsewhere) -> no overflow in dead lanes.
    out_ref[...] = jnp.where(is_sigma, jnp.exp(jnp.where(is_sigma, head, 0.0)), head)


# ------------------------------------------------------------------
# Parameter packing: fuse heads + zero-pad ragged dims to clean tiles
# (call once and cache; do NOT re-pack per forward call)
# ------------------------------------------------------------------
def pack_params(p):
    d_in, hidden = p["w1"].shape
    action = p["wmu"].shape[1]
    dp = _ceil_to(d_in, LANE)
    hp = _ceil_to(hidden, LANE)
    op = _ceil_to(2 * action, LANE)

    w_heads = jnp.concatenate([p["wmu"], p["wstd"]], axis=1)   # (H, 2A)
    b_heads = jnp.concatenate([p["bmu"], p["bstd"]], axis=1)   # (1, 2A)

    return {
        "w1": _pad2(p["w1"], dp, hp),
        "b1": _pad2(p["b1"], 1, hp),
        "w2": _pad2(p["w2"], hp, hp),
        "b2": _pad2(p["b2"], 1, hp),
        "wh": _pad2(w_heads, hp, op),
        "bh": _pad2(b_heads, 1, op),
        "action_dim": action,   # python int (static)
        "d_in": d_in,           # python int (static)
    }


def _pick_block(bp, row_block):
    """Pick the per-grid-step row block.

    Big blocks (>=512 rows) amortize the ~0.35 us/step grid overhead; but for
    large batches we force >= 2 grid steps so dimension_semantics=("parallel",)
    can shard rows across v7x's two TensorCores.
    Returns (block_b, num_blocks), both block_b*num_blocks >= bp and block_b % 8 == 0.
    """
    if bp <= 512:
        return bp, 1
    nblk = max(2, pl.cdiv(bp, row_block))
    block = _ceil_to(pl.cdiv(bp, nblk), SUBLANE)
    return block, nblk


# ------------------------------------------------------------------
# Wrapper
# ------------------------------------------------------------------
def policy_forward(x, packed, *, row_block=1024, return_slab=False):
    """x: (B, D_in) f32; packed: output of pack_params.

    Returns (mu, sigma), each (B, A).  With return_slab=True, returns the raw
    (B_padded, 128) slab (mu in lanes [0:A], sigma in [A:2A]) so the consumer can
    slice lazily and avoid re-reading the slab twice.
    """
    b, d_in = x.shape
    assert d_in == packed["d_in"]
    a = packed["action_dim"]
    dp, hp = packed["w1"].shape
    op = packed["wh"].shape[1]

    bp = _ceil_to(b, SUBLANE)
    block_b, nblk = _pick_block(bp, row_block)
    bp2 = block_b * nblk

    # Only pad rows (never lanes) and only when actually needed -> no pad HLO at
    # common small batch sizes.
    x_p = x if bp2 == b else jnp.pad(x, ((0, bp2 - b), (0, 0)))

    kernel = functools.partial(policy_kernel, action_dim=a, d_in=d_in)

    def full_spec(arr):
        # Weights/biases stay whole-array VMEM-resident (constant index_map).
        # pl.Buffered(1) would drop their second buffer, but the saving is
        # ~0.2 MiB so we keep the default.
        return pl.BlockSpec(arr.shape, lambda i: (0, 0))

    out = pl.pallas_call(
        kernel,
        out_shape=jax.ShapeDtypeStruct((bp2, op), jnp.float32),
        grid=(nblk,),
        in_specs=[
            pl.BlockSpec((block_b, d_in), lambda i: (i, 0)),   # natural-width x
            full_spec(packed["w1"]), full_spec(packed["b1"]),
            full_spec(packed["w2"]), full_spec(packed["b2"]),
            full_spec(packed["wh"]), full_spec(packed["bh"]),
        ],
        out_specs=pl.BlockSpec((block_b, op), lambda i: (i, 0)),
        scratch_shapes=[pltpu.VMEM((block_b, dp), jnp.float32)],
        compiler_params=pltpu.CompilerParams(
            dimension_semantics=("parallel",)),
    )(x_p, packed["w1"], packed["b1"], packed["w2"], packed["b2"],
      packed["wh"], packed["bh"])

    if return_slab:
        return out
    mu = out[:b, :a]
    sigma = out[:b, a:2 * a]
    return mu, sigma


# ------------------------------------------------------------------
# Deterministic parameter init (orthogonal, like layer_init in the module)
# ------------------------------------------------------------------
def orthogonal_weight(key, out_dim, in_dim, gain):
    """Returns a (in_dim, out_dim) pre-transposed orthogonal weight scaled by gain."""
    big, small = max(out_dim, in_dim), min(out_dim, in_dim)
    a = jax.random.normal(key, (big, small), dtype=jnp.float32)
    q, r = jnp.linalg.qr(a)
    q = q * jnp.sign(jnp.diag(r))[None, :]          # sign-fix like torch orthogonal_
    if out_dim >= in_dim:
        w = q[:out_dim, :in_dim]                    # (out, in)
    else:
        w = q[:in_dim, :out_dim].T                  # (out, in)
    w = gain * w
    return jnp.asarray(w, jnp.float32).T            # store as (in, out)


def init_params(key, shape_in, action_shape, hidden_size=64):
    k1, k2, k3, k4 = jax.random.split(key, 4)
    sqrt2 = float(jnp.sqrt(2.0))
    return {
        "w1":   orthogonal_weight(k1, hidden_size, shape_in, sqrt2),
        "b1":   jnp.zeros((1, hidden_size), jnp.float32),
        "w2":   orthogonal_weight(k2, hidden_size, hidden_size, sqrt2),
        "b2":   jnp.zeros((1, hidden_size), jnp.float32),
        "wmu":  orthogonal_weight(k3, action_shape, hidden_size, 0.01),
        "bmu":  jnp.zeros((1, action_shape), jnp.float32),
        "wstd": orthogonal_weight(k4, action_shape, hidden_size, 0.0),  # gain=0 -> sigma=1
        "bstd": jnp.zeros((1, action_shape), jnp.float32),
    }


# ------------------------------------------------------------------
# Pure-JAX reference for correctness sanity checks
# ------------------------------------------------------------------
def policy_forward_ref(x, p):
    h1 = jnp.tanh(x @ p["w1"] + p["b1"])
    h2 = jnp.tanh(h1 @ p["w2"] + p["b2"])
    mu = h2 @ p["wmu"] + p["bmu"]
    sigma = jnp.exp(h2 @ p["wstd"] + p["bstd"])
    return mu, sigma


if __name__ == "__main__":
    # HalfCheetah-ish sizes: obs dim 17, action dim 6, hidden 64.
    SHAPE_IN, ACTION, HIDDEN = 17, 6, 64

    key = jax.random.PRNGKey(0)
    kx, kx2, kp = jax.random.split(key, 3)
    params = init_params(kp, SHAPE_IN, ACTION, HIDDEN)
    packed = pack_params(params)

    # --- small batch (rollout-step path: single grid step, no wrapper pads) ---
    B = 8
    x = jax.random.normal(kx, (B, SHAPE_IN), dtype=jnp.float32)
    mu, sigma = policy_forward(x, packed)
    jax.block_until_ready((mu, sigma))
    mu_ref, sigma_ref = policy_forward_ref(x, params)
    assert mu.shape == (B, ACTION) and sigma.shape == (B, ACTION)
    assert jnp.allclose(mu, mu_ref, atol=1e-4, rtol=1e-4)
    assert jnp.allclose(sigma, sigma_ref, atol=1e-4, rtol=1e-4)

    # --- larger batch (multi-step grid: exercises row padding + 2 grid steps) ---
    B2 = 1000
    x2 = jax.random.normal(kx2, (B2, SHAPE_IN), dtype=jnp.float32)
    mu2, sigma2 = policy_forward(x2, packed)
    jax.block_until_ready((mu2, sigma2))
    mu2_ref, sigma2_ref = policy_forward_ref(x2, params)
    assert mu2.shape == (B2, ACTION) and sigma2.shape == (B2, ACTION)
    assert jnp.allclose(mu2, mu2_ref, atol=1e-4, rtol=1e-4)
    assert jnp.allclose(sigma2, sigma2_ref, atol=1e-4, rtol=1e-4)

    print("KERNEL_OK")
</pallas_src>

<mosaic_0001>
module attributes {stable_mosaic.version = 11 : i64} {
  func.func @policy_kernel(%arg0: i32, %arg1: memref<8x17xf32, #tpu.memory_space<vmem>>, %arg2: memref<128x128xf32, #tpu.memory_space<vmem>>, %arg3: memref<1x128xf32, #tpu.memory_space<vmem>>, %arg4: memref<128x128xf32, #tpu.memory_space<vmem>>, %arg5: memref<1x128xf32, #tpu.memory_space<vmem>>, %arg6: memref<128x128xf32, #tpu.memory_space<vmem>>, %arg7: memref<1x128xf32, #tpu.memory_space<vmem>>, %arg8: memref<8x128xf32, #tpu.memory_space<vmem>>, %arg9: memref<8x128xf32, #tpu.memory_space<vmem>>) attributes {dimension_semantics = [#tpu.dimension_semantics<parallel>], iteration_bounds = array<i64: 1>, scalar_prefetch = 0 : i64, scratch_operands = 1 : i64, tpu.core_type = #tpu.core_type<tc>, window_params = [{transform_indices = @transform_0, window_bounds = array<i64: 8, 17>}, {pipeline_mode = #tpu.pipeline_mode<synchronous>, transform_indices = @transform_1, window_bounds = array<i64: 128, 128>}, {pipeline_mode = #tpu.pipeline_mode<synchronous>, transform_indices = @transform_2, window_bounds = array<i64: 1, 128>}, {pipeline_mode = #tpu.pipeline_mode<synchronous>, transform_indices = @transform_3, window_bounds = array<i64: 128, 128>}, {pipeline_mode = #tpu.pipeline_mode<synchronous>, transform_indices = @transform_4, window_bounds = array<i64: 1, 128>}, {pipeline_mode = #tpu.pipeline_mode<synchronous>, transform_indices = @transform_5, window_bounds = array<i64: 128, 128>}, {pipeline_mode = #tpu.pipeline_mode<synchronous>, transform_indices = @transform_6, window_bounds = array<i64: 1, 128>}, {transform_indices = @transform_7, window_bounds = array<i64: 8, 128>}]} {
    %cst = arith.constant 0.000000e+00 : f32
    %0 = vector.broadcast %cst : f32 to vector<8x128xf32>
    %c0 = arith.constant 0 : index
    %c0_0 = arith.constant 0 : index
    %1 = vector.load %arg9[%c0, %c0_0] : memref<8x128xf32, #tpu.memory_space<vmem>>, vector<8x128xf32>
    tpu.vector_store %arg9[%c0, %c0_0], %0 {strides = array<i32>} : memref<8x128xf32, #tpu.memory_space<vmem>>, vector<8x128xf32>,
    %c0_1 = arith.constant 0 : index
    %c0_2 = arith.constant 0 : index
    %2 = vector.load %arg1[%c0_1, %c0_2] : memref<8x17xf32, #tpu.memory_space<vmem>>, vector<8x17xf32>
    %c0_3 = arith.constant 0 : index
    %c0_4 = arith.constant 0 : index
    %3 = vector.load %arg9[%c0_3, %c0_4] : memref<8x128xf32, #tpu.memory_space<vmem>>, vector<8x17xf32>
    tpu.vector_store %arg9[%c0_3, %c0_4], %2 {strides = array<i32>} : memref<8x128xf32, #tpu.memory_space<vmem>>, vector<8x17xf32>,
    %c0_5 = arith.constant 0 : index
    %c0_6 = arith.constant 0 : index
    %4 = vector.load %arg9[%c0_5, %c0_6] : memref<8x128xf32, #tpu.memory_space<vmem>>, vector<8x128xf32>
    %c0_7 = arith.constant 0 : index
    %c0_8 = arith.constant 0 : index
    %5 = vector.load %arg2[%c0_7, %c0_8] : memref<128x128xf32, #tpu.memory_space<vmem>>, vector<128x128xf32>
    %cst_9 = arith.constant dense<0.000000e+00> : vector<8x128xf32>
    %6 = tpu.matmul %4, %5, %cst_9 {dimension_numbers = #tpu.dot_dimension_numbers<[1], [0], [0], [1], [0, 0, 1, 1], [], []>} : vector<8x128xf32>, vector<128x128xf32>, vector<8x128xf32> -> vector<8x128xf32>
    %c0_10 = arith.constant 0 : index
    %c0_11 = arith.constant 0 : index
    %7 = vector.load %arg3[%c0_10, %c0_11] : memref<1x128xf32, #tpu.memory_space<vmem>>, vector<1x128xf32>
    %8 = vector.broadcast %7 : vector<1x128xf32> to vector<8x128xf32>
    %9 = arith.addf %6, %8 : vector<8x128xf32>
    %10 = math.tanh %9 : vector<8x128xf32>
    %c0_12 = arith.constant 0 : index
    %c0_13 = arith.constant 0 : index
    %11 = vector.load %arg4[%c0_12, %c0_13] : memref<128x128xf32, #tpu.memory_space<vmem>>, vector<128x128xf32>
    %cst_14 = arith.constant dense<0.000000e+00> : vector<8x128xf32>
    %12 = tpu.matmul %10, %11, %cst_14 {dimension_numbers = #tpu.dot_dimension_numbers<[1], [0], [0], [1], [0, 0, 1, 1], [], []>} : vector<8x128xf32>, vector<128x128xf32>, vector<8x128xf32> -> vector<8x128xf32>
    %c0_15 = arith.constant 0 : index
    %c0_16 = arith.constant 0 : index
    %13 = vector.load %arg5[%c0_15, %c0_16] : memref<1x128xf32, #tpu.memory_space<vmem>>, vector<1x128xf32>
    %14 = vector.broadcast %13 : vector<1x128xf32> to vector<8x128xf32>
    %15 = arith.addf %12, %14 : vector<8x128xf32>
    %16 = math.tanh %15 : vector<8x128xf32>
    %c0_17 = arith.constant 0 : index
    %c0_18 = arith.constant 0 : index
    %17 = vector.load %arg6[%c0_17, %c0_18] : memref<128x128xf32, #tpu.memory_space<vmem>>, vector<128x128xf32>
    %cst_19 = arith.constant dense<0.000000e+00> : vector<8x128xf32>
    %18 = tpu.matmul %16, %17, %cst_19 {dimension_numbers = #tpu.dot_dimension_numbers<[1], [0], [0], [1], [0, 0, 1, 1], [], []>} : vector<8x128xf32>, vector<128x128xf32>, vector<8x128xf32> -> vector<8x128xf32>
    %c0_20 = arith.constant 0 : index
    %c0_21 = arith.constant 0 : index
    %19 = vector.load %arg7[%c0_20, %c0_21] : memref<1x128xf32, #tpu.memory_space<vmem>>, vector<1x128xf32>
    %20 = vector.broadcast %19 : vector<1x128xf32> to vector<8x128xf32>
    %21 = arith.addf %18, %20 : vector<8x128xf32>
    %22 = tpu.iota {dimensions = array<i32: 1>} : vector<8x128xi32>
    %c6_i32 = arith.constant 6 : i32
    %23 = vector.broadcast %c6_i32 : i32 to vector<8x128xi32>
    %24 = arith.cmpi sge, %22, %23 : vector<8x128xi32>
    %c12_i32 = arith.constant 12 : i32
    %25 = vector.broadcast %c12_i32 : i32 to vector<8x128xi32>
    %26 = arith.cmpi slt, %22, %25 : vector<8x128xi32>
    %27 = arith.andi %24, %26 : vector<8x128xi1>
    %cst_22 = arith.constant 0.000000e+00 : f32
    %28 = vector.broadcast %cst_22 : f32 to vector<8x128xf32>
    %29 = arith.select %27, %21, %28 : vector<8x128xi1>, vector<8x128xf32>
    %30 = math.exp %29 : vector<8x128xf32>
    %31 = arith.select %27, %30, %21 : vector<8x128xi1>, vector<8x128xf32>
    %c0_23 = arith.constant 0 : index
    %c0_24 = arith.constant 0 : index
    %32 = vector.load %arg8[%c0_23, %c0_24] : memref<8x128xf32, #tpu.memory_space<vmem>>, vector<8x128xf32>
    tpu.vector_store %arg8[%c0_23, %c0_24], %31 {strides = array<i32>} : memref<8x128xf32, #tpu.memory_space<vmem>>, vector<8x128xf32>,
    return
  }
  func.func @transform_0(%arg0: i32) -> (i32, i32) {
    %c0_i32 = arith.constant 0 : i32
    %c0_i32_0 = arith.constant 0 : i32
    return %arg0, %c0_i32 : i32, i32
  }
  func.func @transform_1(%arg0: i32) -> (i32, i32) {
    %c0_i32 = arith.constant 0 : i32
    %c0_i32_0 = arith.constant 0 : i32
    %c0_i32_1 = arith.constant 0 : i32
    return %c0_i32, %c0_i32_0 : i32, i32
  }
  func.func @transform_2(%arg0: i32) -> (i32, i32) {
    %c0_i32 = arith.constant 0 : i32
    %c0_i32_0 = arith.constant 0 : i32
    %c0_i32_1 = arith.constant 0 : i32
    return %c0_i32, %c0_i32_0 : i32, i32
  }
  func.func @transform_3(%arg0: i32) -> (i32, i32) {
    %c0_i32 = arith.constant 0 : i32
    %c0_i32_0 = arith.constant 0 : i32
    %c0_i32_1 = arith.constant 0 : i32
    return %c0_i32, %c0_i32_0 : i32, i32
  }
  func.func @transform_4(%arg0: i32) -> (i32, i32) {
    %c0_i32 = arith.constant 0 : i32
    %c0_i32_0 = arith.constant 0 : i32
    %c0_i32_1 = arith.constant 0 : i32
    return %c0_i32, %c0_i32_0 : i32, i32
  }
  func.func @transform_5(%arg0: i32) -> (i32, i32) {
    %c0_i32 = arith.constant 0 : i32
    %c0_i32_0 = arith.constant 0 : i32
    %c0_i32_1 = arith.constant 0 : i32
    return %c0_i32, %c0_i32_0 : i32, i32
  }
  func.func @transform_6(%arg0: i32) -> (i32, i32) {
    %c0_i32 = arith.constant 0 : i32
    %c0_i32_0 = arith.constant 0 : i32
    %c0_i32_1 = arith.constant 0 : i32
    return %c0_i32, %c0_i32_0 : i32, i32
  }
  func.func @transform_7(%arg0: i32) -> (i32, i32) {
    %c0_i32 = arith.constant 0 : i32
    %c0_i32_0 = arith.constant 0 : i32
    return %arg0, %c0_i32 : i32, i32
  }
}

</mosaic_0001>

<bundles_post_ra>
// kernel: tpu_custom_call.1
= control target key start
LH: loop header
LB: loop body
LE: loop exit
PB: predicated region body
PF: predicated region fallthrough
CT: control target
= control target key end

     0   :  { %12 = vsyncpa [#allocation4], 0  ;;  %s812_s0 = inlined_call_operand.hbm [shape: f32[8,17], index: 0, kind: input, shape index: {}]   ;;  %s813_s1 = inlined_call_operand.hbm [shape: f32[128,128], index: 1, kind: input, shape index: {}]   ;;  %s814_s2 = inlined_call_operand.vmem [shape: f32[1,128], index: 2, kind: input, shape index: {}]   ;;  %s815_s3 = inlined_call_operand.hbm [shape: f32[128,128], index: 3, kind: input, shape index: {}]   ;;  %s816_s4 = inlined_call_operand.vmem [shape: f32[1,128], index: 4, kind: input, shape index: {}]   ;;  %s817_s5 = inlined_call_operand.hbm [shape: f32[128,128], index: 5, kind: input, shape index: {}]   ;;  %s818_s6 = inlined_call_operand.vmem [shape: f32[1,128], index: 6, kind: input, shape index: {}]   ;;  %s819_s7 = inlined_call_operand.hbm [shape: f32[8,128], index: 7, kind: output, shape index: {}]  }
   0x1   :  { %13 = vsyncpa [#allocation7], 0 }
   0x2   :  { %14 = vsyncpa [#allocation10], 0 }
   0x3   :  { %15 = vsyncpa [#allocation5], 0  ;;  %s675_s24 = smov [#allocation6]  }
   0x4   :  { %s31_s25 = sshll.u32 %s675_s24, 4  ;;  %s32_s25 = int_to_ptr.vmem [resolvable:$true] %s31_s25 }
   0x5   :  { %s575_s26 = scalar_lea.vmem %s32_s25, 2048  ;;  %p580_p1 = scmp.lt.s32.totalorder %s32_s25, %s32_s25 }
   0x6   :  { %p576_p0 = scmp.ne.s32.totalorder %s32_s25, %s575_s26  ;;  %p581_p2 = scmp.lt.s32.totalorder %s575_s26, %s575_s26 }
   0x8   :  { %p582_p3 = por %p581_p2, %p580_p1 }
   0xa   :  { %p583_p4 = pnand %p582_p3, %p576_p0 }
   0xc   :  { %586 = shalt.err (!%p583_p4)
}
   0xd   :  { %s676_s27 = smov 128   ;;  %s677_s28 = smov 8  }
   0xe   :  { %37 = dma.hbm_to_vmem [thread:$0]  %s813_s1, 2048, %s32_s25, [#allocation7], %s676_s27, %s676_s27, %s677_s28  }
   0xf   :  { %s678_s8 = smov [#allocation3]   ;;  %s679_s10 = smov [#allocation8]  }
  0x10   :  { %s22_s9 = sshll.u32 %s678_s8, 4  ;;  %s45_s11 = sshll.u32 %s679_s10, 4  ;;  %s23_s9 = int_to_ptr.vmem [resolvable:$true] %s22_s9  ;;  %s46_s11 = int_to_ptr.vmem [resolvable:$true] %s45_s11 }
  0x11   :  { %s595_s12 = scalar_lea.vmem %s23_s9, 128  ;;  %p600_p6 = scmp.lt.s32.totalorder %s23_s9, %s23_s9 }
  0x12   :  { %p596_p5 = scmp.ne.s32.totalorder %s23_s9, %s595_s12  ;;  %p601_p7 = scmp.lt.s32.totalorder %s595_s12, %s595_s12 }
  0x14   :  { %p602_p8 = por %p601_p7, %p600_p6 }
  0x16   :  { %p603_p9 = pnand %p602_p8, %p596_p5 }
  0x18   :  { %606 = shalt.err (!%p603_p9)
}
  0x19   :  { %25 = dma.hbm_to_vmem [thread:$0]  %s812_s0, 128, %s23_s9, [#allocation4]  }
  0x1a   :  { %s615_s15 = scalar_lea.vmem %s46_s11, 2048  ;;  %p620_p11 = scmp.lt.s32.totalorder %s46_s11, %s46_s11 }
  0x1b   :  { %p616_p10 = scmp.ne.s32.totalorder %s46_s11, %s615_s15  ;;  %p621_p12 = scmp.lt.s32.totalorder %s615_s15, %s615_s15 }
  0x1d   :  { %p622_p13 = por %p621_p12, %p620_p11 }
  0x1f   :  { %p623_p0 = pnand %p622_p13, %p616_p10 }
  0x21   :  { %626 = shalt.err (!%p623_p0)
}
  0x22   :  { %51 = dma.hbm_to_vmem [thread:$0]  %s815_s3, 2048, %s46_s11, [#allocation7], %s676_s27, %s676_s27, %s677_s28  }
  0x23   :  { %s680_s17 = smov [#allocation9]  }
  0x24   :  { %s59_s18 = sshll.u32 %s680_s17, 4  ;;  %s60_s18 = int_to_ptr.vmem [resolvable:$true] %s59_s18 }
  0x25   :  { %s635_s19 = scalar_lea.vmem %s60_s18, 2048  ;;  %p640_p2 = scmp.lt.s32.totalorder %s60_s18, %s60_s18 }
  0x26   :  { %p636_p1 = scmp.ne.s32.totalorder %s60_s18, %s635_s19  ;;  %p641_p3 = scmp.lt.s32.totalorder %s635_s19, %s635_s19 }
  0x28   :  { %p642_p4 = por %p641_p3, %p640_p2 }
  0x2a   :  { %p643_p5 = pnand %p642_p4, %p636_p1 }
  0x2c   :  { %646 = shalt.err (!%p643_p5)
}
  0x2d   :  { %65 = dma.hbm_to_vmem [thread:$0]  %s817_s5, 2048, %s60_s18, [#allocation10], %s676_s27, %s676_s27, %s677_s28  }
  0x2e   :  { %667 = dma.done.wait [#allocation4], 128  }
  0x2f   :  { %668 = vsyncadd [#allocation4], 4294967168 }
  0x30   :  { %669 = dma.done.wait [#allocation7], 4096  }
  0x31   :  { %670 = vsyncadd [#allocation7], 4294963200 }
  0x32   :  { %671 = dma.done.wait [#allocation10], 2048  }
  0x33   :  { %672 = vsyncadd [#allocation10], 4294965248  ;;  %v681_v0 = vmov 0.0   ;;  %vm682_vm0 = vmmov 0   ;;  %v100_v1 = vld [vmem:[#allocation6 + $0x78] sm:$0xff]  ;;  %v99_v2 = vld [vmem:[#allocation6 + $0x70] sm:$0xff]  ;;  %v366_v61 = vlaneseq }
  0x34   :  { %447 = vmatprep.subr.mxu0 %v681_v0  ;;  %80 = vst [vmem:[#allocation2] sm:$0xff] %v681_v0  ;;  %479 = vmatprep.mubr.msk.f32.mxu0 %vm682_vm0, %v681_v0  ;;  %v98_v3 = vld [vmem:[#allocation6 + $0x68] sm:$0xff]  ;;  %vm82_vm1 = vcmask 138240   ;;  %v97_v4 = vld [vmem:[#allocation6 + $0x60] sm:$0xff]  ;;  %v81_v5 = vld [vmem:[#allocation3] sm:$0xff] }
  0x35   :  { %482 = vmatprep.subr.mxu1 %v681_v0  ;;  %514 = vmatprep.mubr.msk.f32.mxu1 %vm682_vm0, %v681_v0  ;;  %v194_v6 = vld [vmem:[#allocation8 + $0x78] sm:$0xff]  ;;  %83 = vst.msk [vmem:[#allocation2] sm:$0xff] %vm82_vm1, %v81_v5  ;;  %v193_v8 = vld [vmem:[#allocation8 + $0x70] sm:$0xff]  ;;  %v192_v9 = vld [vmem:[#allocation8 + $0x68] sm:$0xff]  ;;  %v367_v62 = vand.u32 127, %v366_v61 }
  0x36   :  { %448 = vmatpush3.msra.mxu0 %v100_v1  ;;  %v96_v7 = vld [vmem:[#allocation6 + $0x58] sm:$0xff]  ;;  %483 = vmatpush3.msra.mxu1 %v194_v6  ;;  %v95_v10 = vld [vmem:[#allocation6 + $0x50] sm:$0xff]  ;;  %v191_v11 = vld [vmem:[#allocation8 + $0x60] sm:$0xff] }
  0x37   :  { %449 = vmatprep.subr.mxu0 %v681_v0  ;;  %484 = vmatprep.subr.mxu1 %v681_v0  ;;  %v94_v12 = vld [vmem:[#allocation6 + $0x48] sm:$0xff]  ;;  %v190_v13 = vld [vmem:[#allocation8 + $0x58] sm:$0xff]  ;;  %v93_v14 = vld [vmem:[#allocation6 + $0x40] sm:$0xff]  ;;  %vm368_vm2 = vcmp.ge.s32.totalorder %v367_v62, 6  ;;  %vm369_vm3 = vcmp.lt.s32.totalorder %v367_v62, 12 }
  0x38   :  { %450 = vmatpush3.msra.mxu0 %v99_v2  ;;  %485 = vmatpush3.msra.mxu1 %v193_v8  ;;  %v189_v15 = vld [vmem:[#allocation8 + $0x50] sm:$0xff]  ;;  %v92_v16 = vld [vmem:[#allocation6 + $0x38] sm:$0xff]  ;;  %v188_v17 = vld [vmem:[#allocation8 + $0x48] sm:$0xff] }
  0x39   :  { %451 = vmatprep.subr.mxu0 %v681_v0  ;;  %486 = vmatprep.subr.mxu1 %v681_v0  ;;  %v91_v18 = vld [vmem:[#allocation6 + $0x30] sm:$0xff]  ;;  %v90_v19 = vld [vmem:[#allocation6 + $0x28] sm:$0xff]  ;;  %v89_v20 = vld [vmem:[#allocation6 + $0x20] sm:$0xff] }
  0x3a   :  { %452 = vmatpush3.msra.mxu0 %v98_v3  ;;  %487 = vmatpush3.msra.mxu1 %v192_v9  ;;  %v88_v21 = vld [vmem:[#allocation6 + $0x18] sm:$0xff]  ;;  %v87_v22 = vld [vmem:[#allocation6 + $0x10] sm:$0xff]  ;;  %v86_v23 = vld [vmem:[#allocation6 + $0x8] sm:$0xff] }
  0x3b   :  { %453 = vmatprep.subr.mxu0 %v681_v0  ;;  %488 = vmatprep.subr.mxu1 %v681_v0  ;;  %v85_v24 = vld [vmem:[#allocation6] sm:$0xff]  ;;  %v186_v27 = vld [vmem:[#allocation8 + $0x38] sm:$0xff]  ;;  %v185_v28 = vld [vmem:[#allocation8 + $0x30] sm:$0xff] }
  0x3c   :  { %454 = vmatpush3.msra.mxu0 %v97_v4  ;;  %489 = vmatpush3.msra.mxu1 %v191_v11  ;;  %v84_v25 = vld [vmem:[#allocation2] sm:$0xff]  ;;  %v187_v26 = vld [vmem:[#allocation8 + $0x40] sm:$0xff]  ;;  %v184_v29 = vld [vmem:[#allocation8 + $0x28] sm:$0xff] }
  0x3d   :  { %455 = vmatprep.subr.mxu0 %v681_v0  ;;  %490 = vmatprep.subr.mxu1 %v681_v0  ;;  %v183_v30 = vld [vmem:[#allocation8 + $0x20] sm:$0xff]  ;;  %v182_v31 = vld [vmem:[#allocation8 + $0x18] sm:$0xff]  ;;  %v181_v32 = vld [vmem:[#allocation8 + $0x10] sm:$0xff] }
  0x3e   :  { %456 = vmatpush3.msra.mxu0 %v96_v7  ;;  %491 = vmatpush3.msra.mxu1 %v190_v13  ;;  %v180_v33 = vld [vmem:[#allocation8 + $0x8] sm:$0xff]  ;;  %v179_v34 = vld [vmem:[#allocation8] sm:$0xff]  ;;  %v288_v35 = vld [vmem:[#allocation9 + $0x78] sm:$0xff] }
  0x3f   :  { %457 = vmatprep.subr.mxu0 %v681_v0  ;;  %492 = vmatprep.subr.mxu1 %v681_v0  ;;  %v287_v36 = vld [vmem:[#allocation9 + $0x70] sm:$0xff]  ;;  %v286_v37 = vld [vmem:[#allocation9 + $0x68] sm:$0xff]  ;;  %v285_v38 = vld [vmem:[#allocation9 + $0x60] sm:$0xff] }
  0x40   :  { %458 = vmatpush3.msra.mxu0 %v95_v10  ;;  %493 = vmatpush3.msra.mxu1 %v189_v15  ;;  %v284_v39 = vld [vmem:[#allocation9 + $0x58] sm:$0xff]  ;;  %v283_v40 = vld [vmem:[#allocation9 + $0x50] sm:$0xff]  ;;  %v282_v41 = vld [vmem:[#allocation9 + $0x48] sm:$0xff] }
  0x41   :  { %459 = vmatprep.subr.mxu0 %v681_v0  ;;  %494 = vmatprep.subr.mxu1 %v681_v0  ;;  %v393_v42 = vld [vmem:[%s814_s2] ss:$0 sm:$0xff]  ;;  %v281_v47 = vld [vmem:[#allocation9 + $0x40] sm:$0xff]  ;;  %v280_v48 = vld [vmem:[#allocation9 + $0x38] sm:$0xff] }
  0x42   :  { %460 = vmatpush3.msra.mxu0 %v94_v12  ;;  %495 = vmatpush3.msra.mxu1 %v188_v17  ;;  %v279_v49 = vld [vmem:[#allocation9 + $0x30] sm:$0xff]  ;;  %v278_v50 = vld [vmem:[#allocation9 + $0x28] sm:$0xff]  ;;  %v277_v51 = vld [vmem:[#allocation9 + $0x20] sm:$0xff] }
  0x43   :  { %461 = vmatprep.subr.mxu0 %v681_v0  ;;  %496 = vmatprep.subr.mxu1 %v681_v0  ;;  %v276_v52 = vld [vmem:[#allocation9 + $0x18] sm:$0xff]  ;;  %v275_v53 = vld [vmem:[#allocation9 + $0x10] sm:$0xff]  ;;  %v274_v54 = vld [vmem:[#allocation9 + $0x8] sm:$0xff] }
  0x44   :  { %462 = vmatpush3.msra.mxu0 %v93_v14  ;;  %497 = vmatpush3.msra.mxu1 %v187_v26  ;;  %v273_v55 = vld [vmem:[#allocation9] sm:$0xff]  ;;  %v394_v56 = vld [vmem:[%s816_s4] ss:$0 sm:$0xff]  ;;  %vm370_vm4 = vmand %vm368_vm2, %vm369_vm3  ;;  %s683_s4 = smov [#allocation11]  }
  0x45   :  { %463 = vmatprep.subr.mxu0 %v681_v0  ;;  %498 = vmatprep.subr.mxu1 %v681_v0  ;;  %v395_v63 = vld [vmem:[%s818_s6] ss:$0 sm:$0xff]  ;;  %s382_s24 = sshll.u32 %s683_s4, 4  ;;  %s383_s24 = int_to_ptr.vmem [resolvable:$true] %s382_s24 }
  0x46   :  { %464 = vmatpush3.msra.mxu0 %v92_v16  ;;  %499 = vmatpush3.msra.mxu1 %v186_v27  ;;  %s647_s25 = scalar_lea.vmem %s383_s24, 128  ;;  %p652_p7 = scmp.lt.s32.totalorder %s383_s24, %s383_s24 }
  0x47   :  { %465 = vmatprep.subr.mxu0 %v681_v0  ;;  %500 = vmatprep.subr.mxu1 %v681_v0  ;;  %p648_p6 = scmp.ne.s32.totalorder %s383_s24, %s647_s25  ;;  %p653_p8 = scmp.lt.s32.totalorder %s647_s25, %s647_s25 }
  0x48   :  { %466 = vmatpush3.msra.mxu0 %v91_v18  ;;  %501 = vmatpush3.msra.mxu1 %v185_v28 }
  0x49   :  { %467 = vmatprep.subr.mxu0 %v681_v0  ;;  %502 = vmatprep.subr.mxu1 %v681_v0  ;;  %p654_p9 = por %p653_p8, %p652_p7 }
  0x4a   :  { %468 = vmatpush3.msra.mxu0 %v90_v19  ;;  %503 = vmatpush3.msra.mxu1 %v184_v29 }
  0x4b   :  { %469 = vmatprep.subr.mxu0 %v681_v0  ;;  %504 = vmatprep.subr.mxu1 %v681_v0  ;;  %p655_p10 = pnand %p654_p9, %p648_p6 }
  0x4c   :  { %470 = vmatpush3.msra.mxu0 %v89_v20  ;;  %505 = vmatpush3.msra.mxu1 %v183_v30 }
  0x4d   :  { %471 = vmatprep.subr.mxu0 %v681_v0  ;;  %506 = vmatprep.subr.mxu1 %v681_v0 }
  0x4e   :  { %472 = vmatpush3.msra.mxu0 %v88_v21  ;;  %507 = vmatpush3.msra.mxu1 %v182_v31 }
  0x4f   :  { %473 = vmatprep.subr.mxu0 %v681_v0  ;;  %508 = vmatprep.subr.mxu1 %v681_v0 }
  0x50   :  { %474 = vmatpush3.msra.mxu0 %v87_v22  ;;  %509 = vmatpush3.msra.mxu1 %v181_v32 }
  0x51   :  { %475 = vmatprep.subr.mxu0 %v681_v0  ;;  %510 = vmatprep.subr.mxu1 %v681_v0 }
  0x52   :  { %476 = vmatpush3.msra.mxu0 %v86_v23  ;;  %511 = vmatpush3.msra.mxu1 %v180_v33 }
  0x53   :  { %477 = vmatprep.subr.mxu0 %v681_v0  ;;  %512 = vmatprep.subr.mxu1 %v681_v0 }
  0x54   :  { %478 = vmatpush3.msra.mxu0 %v85_v24  ;;  %513 = vmatpush3.msra.mxu1 %v179_v34 }
  0x55   :  { %480 = vmatmul.mubr.f32.vlgmr.msra.gmra.mxu0 %v84_v25  ;;  %517 = vmatprep.subr.mxu0 %v681_v0 }
  0x56   :  { %549 = vmatprep.mubr.msk.f32.mxu0 %vm682_vm0, %v681_v0  ;;  %518 = vmatpush3.msra.mxu0 %v288_v35 }
  0x57   :  { %519 = vmatprep.subr.mxu0 %v681_v0 }
  0x58   :  { %520 = vmatpush3.msra.mxu0 %v287_v36 }
  0x59   :  { %521 = vmatprep.subr.mxu0 %v681_v0 }
  0x5a   :  { %522 = vmatpush3.msra.mxu0 %v286_v37 }
  0x5b   :  { %523 = vmatprep.subr.mxu0 %v681_v0 }
  0x5c   :  { %524 = vmatpush3.msra.mxu0 %v285_v38 }
  0x5d   :  { %525 = vmatprep.subr.mxu0 %v681_v0 }
  0x5e   :  { %526 = vmatpush3.msra.mxu0 %v284_v39 }
  0x5f   :  { %527 = vmatprep.subr.mxu0 %v681_v0 }
  0x60   :  { %528 = vmatpush3.msra.mxu0 %v283_v40 }
  0x61   :  { %529 = vmatprep.subr.mxu0 %v681_v0 }
  0x62   :  { %530 = vmatpush3.msra.mxu0 %v282_v41 }
  0x63   :  { %531 = vmatprep.subr.mxu0 %v681_v0 }
  0x64   :  { %532 = vmatpush3.msra.mxu0 %v281_v47 }
  0x65   :  { %533 = vmatprep.subr.mxu0 %v681_v0 }
  0x66   :  { %534 = vmatpush3.msra.mxu0 %v280_v48 }
  0x67   :  { %535 = vmatprep.subr.mxu0 %v681_v0 }
  0x68   :  { %536 = vmatpush3.msra.mxu0 %v279_v49 }
  0x69   :  { %537 = vmatprep.subr.mxu0 %v681_v0 }
  0x6a   :  { %538 = vmatpush3.msra.mxu0 %v278_v50 }
  0x6b   :  { %539 = vmatprep.subr.mxu0 %v681_v0 }
  0x6c   :  { %540 = vmatpush3.msra.mxu0 %v277_v51 }
  0x6d   :  { %541 = vmatprep.subr.mxu0 %v681_v0 }
  0x6e   :  { %542 = vmatpush3.msra.mxu0 %v276_v52 }
  0x6f   :  { %543 = vmatprep.subr.mxu0 %v681_v0 }
  0x70   :  { %544 = vmatpush3.msra.mxu0 %v275_v53 }
  0x71   :  { %545 = vmatprep.subr.mxu0 %v681_v0 }
  0x72   :  { %546 = vmatpush3.msra.mxu0 %v274_v54 }
  0x73   :  { %547 = vmatprep.subr.mxu0 %v681_v0 }
  0x74   :  { %548 = vmatpush3.msra.mxu0 %v273_v55 }
 0x115   :  { %v174_v43 = vpop.f32.mrf.mxu0 }
 0x116   :  { %v175_v44 = vadd.f32 %v393_v42, %v174_v43 }
 0x117   :  { %v481_v45 = vpop.f32.mrf.mxu0 }
 0x118   :  { %561 = vtanh.f32 %v175_v44 }
 0x125   :  { %v562_v46 = vpop.eup %561 }
 0x126   :  { %515 = vmatmul.mubr.f32.vlgmr.msra.gmra.mxu1 %v562_v46 }
 0x1e6   :  { %v268_v57 = vpop.f32.mrf.mxu1 }
 0x1e7   :  { %v269_v58 = vadd.f32 %v394_v56, %v268_v57 }
 0x1e8   :  { %v516_v59 = vpop.f32.mrf.mxu1 }
 0x1e9   :  { %563 = vtanh.f32 %v269_v58 }
 0x1f6   :  { %v564_v60 = vpop.eup %563 }
 0x1f7   :  { %550 = vmatmul.mubr.f32.vlgmr.msra.gmra.mxu0 %v564_v60 }
 0x2b7   :  { %v362_v0 = vpop.f32.mrf.mxu0 }
 0x2b8   :  { %v363_v1 = vadd.f32 %v395_v63, %v362_v0 }
 0x2b9   :  { %v551_v2 = vpop.f32.mrf.mxu0 }
 0x2ba   :  { %v371_v3 = vsel %vm370_vm4, %v363_v1, 0.0 }
 0x2bb   :  { %v372_v4 = vmul.f32 1.442695, %v371_v3 }
 0x2bd   :  { %565 = vpow2.f32 %v372_v4 }
 0x2ca   :  { %v566_v5 = vpop.eup %565 }
 0x2cb   :  { %v374_v6 = vsel %vm370_vm4, %v566_v5, %v363_v1 }
 0x2cc   :  { %375 = vst [vmem:[#allocation11] sm:$0xff] %v374_v6 }
 0x2cd   :  { %658 = shalt.err (!%p655_p10)
}
 0x2ce   :  { %385 = dma.vmem_to_hbm [thread:$0]  %s383_s24, 128, %s819_s7, [#allocation5]  }
 0x2cf   :  { %673 = dma.done.wait [#allocation5], 128  }
 0x2d0   :  { %674 = vsyncadd [#allocation5], 4294967168 }
 0x2d1   :  { %389 = vsyncpa [#allocation4], 1 }
 0x2d2   :  { %390 = vsyncpa [#allocation7], 1 }
 0x2d3   :  { %391 = vsyncpa [#allocation10], 1 }
 0x2d4   :  { %392 = vsyncpa [#allocation5], 1 }

</bundles_post_ra>
